<compile_context>
chip_gen: v7x
topology: tpu7x:2x2x1
jax: 0.10.0
libtpu: 0.0.40
codegen_flags: <defaults>
</compile_context>

<pallas_src>
import numpy as np
import jax
import jax.numpy as jnp
from jax.experimental import pallas as pl
from jax.experimental.pallas import tpu as pltpu


def _fused_add_linear_kernel(x_ref, w_ref, b_ref, xres_ref, o_ref, acc_ref):
    # x_ref:    (tm, tk)   LHS tile of x (stream dtype)   block index (i, k)
    # w_ref:    (tk, tn)   weight tile (stream dtype)     block index (k, j)
    # b_ref:    (1, tn)    bias tile (full precision)     block index (0, j)
    # xres_ref: (tm, tn)   residual tile (full precision) block index (i, j)
    # o_ref:    (tm, tn)   output tile                    block index (i, j)
    # acc_ref:  (tm, tn)   f32 accumulator scratch (resident across k)
    k = pl.program_id(2)

    @pl.when(k == 0)
    def _():
        # Fold residual + bias into the accumulator init: removes two
        # full-tile VPU adds and one extra accumulator pass from the epilogue.
        acc_ref[...] = (xres_ref[...].astype(jnp.float32)
                        + b_ref[...].astype(jnp.float32))

    acc_ref[...] += jnp.dot(
        x_ref[...], w_ref[...], preferred_element_type=jnp.float32
    )

    @pl.when(k == pl.num_programs(2) - 1)
    def _():
        o_ref[...] = acc_ref[...].astype(o_ref.dtype)


def _round_up(x, m):
    return ((x + m - 1) // m) * m


def _tpu_vmem_capacity_bytes():
    # Trace-time hardware query; fall back to the most conservative
    # (v7x-class, 64 MiB) assumption if unavailable.
    try:
        info = pltpu.get_tpu_info()
        cap = getattr(info, "vmem_capacity_bytes", None)
        if cap:
            return int(cap)
    except Exception:
        pass
    return 64 * 1024 * 1024


def add_residual_linear(x, w, b, *, tile_m=1024, tile_n=1024, tile_k=512,
                        stream_dtype=jnp.bfloat16, input_buffering=None):
    """Computes x + (x @ w + b) with the hot path in a Pallas TPU kernel.

    x: (B, S, H), w: (H, H), b: (H,)

    stream_dtype: dtype for the MXU operand streams (LHS x tiles and W).
      bf16 (default) hits the bf16-native MXU on v5e/v6e/v7x and halves the
      streamed HBM bytes; accumulation is always f32.  Pass None to keep the
      operands in their original dtype (exact f32 path).
    input_buffering: optional int; if >2 and there are multiple K steps, the
      K-streamed inputs get pl.Buffered(n) pipelining.
    """
    B, S, H = x.shape
    M = B * S
    out_dtype = x.dtype

    # Per-generation VMEM budget: 128 MiB-class chips (v5e/v6e) can afford a
    # big scoped limit; v7x (64 MiB physical) stays under ~48 MiB.
    vmem_cap = _tpu_vmem_capacity_bytes()
    big_vmem = vmem_cap >= 100 * 1024 * 1024
    vmem_limit = (96 if big_vmem else 48) * 1024 * 1024

    stream_bytes = (np.dtype(stream_dtype).itemsize
                    if stream_dtype is not None else np.dtype(x.dtype).itemsize)

    # Resident-W fast path: if the whole (H, H) weight fits comfortably in
    # VMEM, use a single N / K block so W is DMA'd exactly once and x / out
    # are streamed exactly once (information-theoretic minimum HBM traffic).
    if H * H * stream_bytes <= 8 * 1024 * 1024:
        tn = H
        tk = H
    else:
        tn = min(tile_n, H)
        tk = min(tile_k, H)
        assert H % 128 == 0, "H must be a multiple of 128 for the tiled path"
        assert H % tn == 0 and H % tk == 0, "tile_n / tile_k must divide H"

    # Round the clamped tm up to a multiple of 8: unmasked, vreg-dense stores.
    tm = _round_up(min(tile_m, M), 8)

    n_blocks = H // tn
    m_blocks = pl.cdiv(M, tm)
    # v7x shards the "parallel" grid axes across its 2 TensorCores; make sure
    # at least one parallel axis has >= 2 blocks when the problem allows it.
    if m_blocks == 1 and n_blocks == 1 and M > 8:
        tm = _round_up(pl.cdiv(M, 2), 8)
        m_blocks = pl.cdiv(M, tm)

    # Pad rows so M divides tm (padded rows are sliced off afterwards).
    M_pad = m_blocks * tm
    x2d = x.reshape(M, H)
    if M_pad != M:
        x2d = jnp.pad(x2d, ((0, M_pad - M), (0, 0)))

    # bf16 (or requested) operand streams for the MXU; residual stays exact.
    if stream_dtype is not None:
        lhs = x2d.astype(stream_dtype)
        w_s = w.astype(stream_dtype)
    else:
        lhs, w_s = x2d, w
    b2d = b.reshape(1, H)

    grid = (m_blocks, n_blocks, H // tk)

    lhs_spec = pl.BlockSpec((tm, tk), lambda i, j, k: (i, k))
    w_spec = pl.BlockSpec((tk, tn), lambda i, j, k: (k, j))
    if input_buffering is not None and input_buffering > 2 and grid[2] > 1:
        # Deeper pipelining on the K-streamed inputs if DMA is exposed.
        lhs_spec = pl.BlockSpec((tm, tk), lambda i, j, k: (i, k),
                                pipeline_mode=pl.Buffered(input_buffering))
        w_spec = pl.BlockSpec((tk, tn), lambda i, j, k: (k, j),
                              pipeline_mode=pl.Buffered(input_buffering))

    out2d = pl.pallas_call(
        _fused_add_linear_kernel,
        out_shape=jax.ShapeDtypeStruct((M_pad, H), out_dtype),
        grid_spec=pltpu.PrefetchScalarGridSpec(
            num_scalar_prefetch=0,
            grid=grid,
            in_specs=[
                lhs_spec,                                        # x LHS tile
                w_spec,                                          # W tile
                pl.BlockSpec((1, tn), lambda i, j, k: (0, j)),   # bias tile
                pl.BlockSpec((tm, tn), lambda i, j, k: (i, j)),  # x residual
            ],
            out_specs=pl.BlockSpec((tm, tn), lambda i, j, k: (i, j)),
            scratch_shapes=[pltpu.VMEM((tm, tn), jnp.float32)],
        ),
        compiler_params=pltpu.CompilerParams(
            # M and N shard across cores; K is the reduction (output block
            # index constant over it), so it must be "arbitrary".
            dimension_semantics=("parallel", "parallel", "arbitrary"),
            vmem_limit_bytes=vmem_limit,
        ),
    )(lhs, w_s, b2d, x2d)

    if M_pad != M:
        out2d = out2d[:M]
    return out2d.reshape(B, S, H)


if __name__ == "__main__":
    # Small demo shapes: batch=2, seq=8, hidden=128 (lane-aligned).
    # H=128 hits the resident-W fast path (tn=tk=H); tm is split to 8 so the
    # M axis has 2 parallel blocks.
    B, S, H = 2, 8, 128
    key = jax.random.PRNGKey(0)
    kx, kw, kb = jax.random.split(key, 3)

    x = jax.random.normal(kx, (B, S, H), dtype=jnp.float32)
    # Deterministic synthetic parameters for the wrapped "model" (a Linear).
    # TODO(synk): the spec's `model` is an arbitrary nn.Module; a Linear is
    # synthesized here as a representative fused inner op.
    w = jax.random.normal(kw, (H, H), dtype=jnp.float32) * 0.02
    b = jax.random.normal(kb, (H,), dtype=jnp.float32) * 0.01

    # Reference: x + model(x) with model = Linear(H, H), all in f32.
    ref = x + (jnp.einsum("bsh,hk->bsk", x, w) + b)

    # Default path: bf16 operand streaming, f32 accumulation.
    out = jax.block_until_ready(add_residual_linear(x, w, b))
    assert out.shape == ref.shape and out.dtype == ref.dtype
    assert jnp.allclose(out, ref, atol=1e-2, rtol=1e-2)

    # Exact path (stream_dtype=None keeps f32 MXU operands): tight tolerance.
    out_f32 = jax.block_until_ready(
        add_residual_linear(x, w, b, stream_dtype=None))
    assert jnp.allclose(out_f32, ref, atol=1e-4, rtol=1e-4)

    print("KERNEL_OK")
</pallas_src>

<mosaic_0001>
module attributes {stable_mosaic.version = 11 : i64} {
  func.func @_fused_add_linear_kernel(%arg0: i32, %arg1: i32, %arg2: i32, %arg3: memref<8x128xbf16, #tpu.memory_space<vmem>>, %arg4: memref<128x128xbf16, #tpu.memory_space<vmem>>, %arg5: memref<1x128xf32, #tpu.memory_space<vmem>>, %arg6: memref<8x128xf32, #tpu.memory_space<vmem>>, %arg7: memref<8x128xf32, #tpu.memory_space<vmem>>, %arg8: memref<8x128xf32, #tpu.memory_space<vmem>>) attributes {dimension_semantics = [#tpu.dimension_semantics<parallel>, #tpu.dimension_semantics<parallel>, #tpu.dimension_semantics<arbitrary>], iteration_bounds = array<i64: 2, 1, 1>, scalar_prefetch = 0 : i64, scratch_operands = 1 : i64, tpu.core_type = #tpu.core_type<tc>, window_params = [{transform_indices = @transform_0, window_bounds = array<i64: 8, 128>}, {transform_indices = @transform_1, window_bounds = array<i64: 128, 128>}, {transform_indices = @transform_2, window_bounds = array<i64: 1, 128>}, {transform_indices = @transform_3, window_bounds = array<i64: 8, 128>}, {transform_indices = @transform_4, window_bounds = array<i64: 8, 128>}]} {
    %c0_i32 = arith.constant 0 : i32
    %0 = arith.cmpi eq, %arg2, %c0_i32 : i32
    %1 = arith.extui %0 : i1 to i32
    %c0_i32_0 = arith.constant 0 : i32
    %2 = arith.cmpi ne, %1, %c0_i32_0 : i32
    scf.if %2 {
      %c0_10 = arith.constant 0 : index
      %c0_11 = arith.constant 0 : index
      %12 = vector.load %arg6[%c0_10, %c0_11] : memref<8x128xf32, #tpu.memory_space<vmem>>, vector<8x128xf32>
      %c0_12 = arith.constant 0 : index
      %c0_13 = arith.constant 0 : index
      %13 = vector.load %arg5[%c0_12, %c0_13] : memref<1x128xf32, #tpu.memory_space<vmem>>, vector<1x128xf32>
      %14 = vector.broadcast %13 : vector<1x128xf32> to vector<8x128xf32>
      %15 = arith.addf %12, %14 : vector<8x128xf32>
      %c0_14 = arith.constant 0 : index
      %c0_15 = arith.constant 0 : index
      %16 = vector.load %arg8[%c0_14, %c0_15] : memref<8x128xf32, #tpu.memory_space<vmem>>, vector<8x128xf32>
      tpu.vector_store %arg8[%c0_14, %c0_15], %15 {strides = array<i32>} : memref<8x128xf32, #tpu.memory_space<vmem>>, vector<8x128xf32>,
    } else {
    }
    %c0 = arith.constant 0 : index
    %c0_1 = arith.constant 0 : index
    %3 = vector.load %arg8[%c0, %c0_1] : memref<8x128xf32, #tpu.memory_space<vmem>>, vector<8x128xf32>
    %c0_2 = arith.constant 0 : index
    %c0_3 = arith.constant 0 : index
    %4 = vector.load %arg3[%c0_2, %c0_3] : memref<8x128xbf16, #tpu.memory_space<vmem>>, vector<8x128xbf16>
    %c0_4 = arith.constant 0 : index
    %c0_5 = arith.constant 0 : index
    %5 = vector.load %arg4[%c0_4, %c0_5] : memref<128x128xbf16, #tpu.memory_space<vmem>>, vector<128x128xbf16>
    %cst = arith.constant dense<0.000000e+00> : vector<8x128xf32>
    %6 = tpu.matmul %4, %5, %cst {dimension_numbers = #tpu.dot_dimension_numbers<[1], [0], [0], [1], [0, 0, 1, 1], [], []>} : vector<8x128xbf16>, vector<128x128xbf16>, vector<8x128xf32> -> vector<8x128xf32>
    %7 = arith.addf %3, %6 : vector<8x128xf32>
    %c0_6 = arith.constant 0 : index
    %c0_7 = arith.constant 0 : index
    %8 = vector.load %arg8[%c0_6, %c0_7] : memref<8x128xf32, #tpu.memory_space<vmem>>, vector<8x128xf32>
    tpu.vector_store %arg8[%c0_6, %c0_7], %7 {strides = array<i32>} : memref<8x128xf32, #tpu.memory_space<vmem>>, vector<8x128xf32>,
    %c0_i32_8 = arith.constant 0 : i32
    %9 = arith.cmpi eq, %arg2, %c0_i32_8 : i32
    %10 = arith.extui %9 : i1 to i32
    %c0_i32_9 = arith.constant 0 : i32
    %11 = arith.cmpi ne, %10, %c0_i32_9 : i32
    scf.if %11 {
      %c0_10 = arith.constant 0 : index
      %c0_11 = arith.constant 0 : index
      %12 = vector.load %arg8[%c0_10, %c0_11] : memref<8x128xf32, #tpu.memory_space<vmem>>, vector<8x128xf32>
      %c0_12 = arith.constant 0 : index
      %c0_13 = arith.constant 0 : index
      %13 = vector.load %arg7[%c0_12, %c0_13] : memref<8x128xf32, #tpu.memory_space<vmem>>, vector<8x128xf32>
      tpu.vector_store %arg7[%c0_12, %c0_13], %12 {strides = array<i32>} : memref<8x128xf32, #tpu.memory_space<vmem>>, vector<8x128xf32>,
    } else {
    }
    return
  }
  func.func @transform_0(%arg0: i32, %arg1: i32, %arg2: i32) -> (i32, i32) {
    %c0_i32 = arith.constant 0 : i32
    return %arg0, %arg2 : i32, i32
  }
  func.func @transform_1(%arg0: i32, %arg1: i32, %arg2: i32) -> (i32, i32) {
    %c0_i32 = arith.constant 0 : i32
    return %arg2, %arg1 : i32, i32
  }
  func.func @transform_2(%arg0: i32, %arg1: i32, %arg2: i32) -> (i32, i32) {
    %c0_i32 = arith.constant 0 : i32
    %c0_i32_0 = arith.constant 0 : i32
    return %c0_i32, %arg1 : i32, i32
  }
  func.func @transform_3(%arg0: i32, %arg1: i32, %arg2: i32) -> (i32, i32) {
    %c0_i32 = arith.constant 0 : i32
    return %arg0, %arg1 : i32, i32
  }
  func.func @transform_4(%arg0: i32, %arg1: i32, %arg2: i32) -> (i32, i32) {
    %c0_i32 = arith.constant 0 : i32
    return %arg0, %arg1 : i32, i32
  }
}

</mosaic_0001>

<bundles_post_ra>
// kernel: tpu_custom_call.1
= control target key start
LH: loop header
LB: loop body
LE: loop exit
PB: predicated region body
PF: predicated region fallthrough
CT: control target
= control target key end

     0   :  { %s1221_s0 = inlined_call_operand.hbm [shape: bf16[16,128], index: 0, kind: input, shape index: {}]   ;;  %s1222_s1 = inlined_call_operand.hbm [shape: bf16[128,128], index: 1, kind: input, shape index: {}]   ;;  %s1223_s2 = inlined_call_operand.vmem [shape: f32[1,128], index: 2, kind: input, shape index: {}]   ;;  %s1224_s3 = inlined_call_operand.hbm [shape: f32[16,128], index: 3, kind: input, shape index: {}]   ;;  %s1225_s4 = inlined_call_operand.hbm [shape: f32[16,128], index: 4, kind: output, shape index: {}]  }
   0x1   :  { %1235 = sst [smem:[#allocation16_spill]] %s1221_s0 }
   0x2   :  { %9 = vsyncpa [#allocation4], 0 }
   0x3   :  { %11 = vsyncpa [#allocation4 + $0x1], 0 }
   0x4   :  { %12 = vsyncpa [#allocation7], 0 }
   0x5   :  { %13 = vsyncpa [#allocation5], 0 }
   0x6   :  { %15 = vsyncpa [#allocation5 + $0x1], 0  ;;  %s948_s15 = smov 0   ;;  %s950_s16 = smov 0  }
   0x7   :  { %s952_s17 = smov 0   ;;  %s954_s18 = smov 0  }
   0x8   :  { %s956_s19 = smov 0   ;;  %s958_s20 = smov 0  }
   0x9 LB: > { %1236 = sst [smem:[#allocation14_spill]] %s909_s19  ;;  %s40_s21 = sadd.s32 1, %s909_s19  ;;  %s913_s20 = sphi %s958_s20, %s21_s20   ;;  %s909_s19 = sphi %s956_s19, %s1256_s19   ;;  %s905_s18 = sphi %s954_s18, %s1255_s18   ;;  %s901_s17 = sphi %s952_s17, %s1259_s17   ;;  %s897_s16 = sphi %s950_s16, %s1258_s16   ;;  %s893_s15 = sphi %s948_s15, %s1257_s15  }
   0xa   : > { %s49_s22 = sadd.s32 1, %s901_s17  ;;  %p42_p0 = scmp.ge.s32.totalorder %s40_s21, 2 }
   0xb   : > { %p56_p1 = scmp.ne.s32.totalorder %s901_s17, %s897_s16  ;;  %p57_p2 = scmp.eq.s32.totalorder %s913_s20, 0 }
   0xc   : > { %s1261_s21 = smov (%p42_p0, %s40_s21), 0  ;;  %p671_p5 = scmp.lt.s32.totalorder %s913_s20, 2 }
   0xd   : > { %1237 = sst [smem:[#allocation15_spill]] %s1261_s21  ;;  %p58_p4 = por %p57_p2, %p56_p1 }
   0xe   : > { %s44_s23 = ssub.s32 %s909_s19, %s1261_s21  ;;  %s219_s24 = sand.u32 1, %s913_s20  }
   0xf   : > { %p47_p6 = scmp.eq.s32.totalorder %s44_s23, 0  ;;  %s221_s25 = sand.u32 1, %s901_s17  }
  0x10   : > { %s595_s26 = sshll.u32 %s909_s19, 6  ;;  %s594_s28 = sshll.u32 %s221_s25, 2 }
  0x11   : > { %s996_s27 = scalar_select %p47_p6, %s901_s17, %s49_s22  }
  0x12   : > { %s1238_s0 = sld [smem:[#allocation16_spill]]  ;;  %p1005_p7 = pnand %p671_p5, %p58_p4 }
  0x13   : > { %s223_s7 = scalar_lea.vmem [#allocation3], %s594_s28  ;;  %s1011_s9 = scalar_lea.sflag [#allocation4], %s219_s24 }
  0x14   : > { %s1239_s6 = scalar_select %p1005_p7, 1, 0 }
  0x15   : > { %s231_s8 = sshll.u32 %s223_s7, 4  ;;  %p1229_p9 = pneg %p1005_p7  ;;  %s1009_s8 = int_to_ptr.vmem [resolvable:$true] %s231_s8 }
  0x18   : > { %s1003_s5 = scalar_lea.hbm %s1238_s0, %s595_s26  ;;  %s740_s13 = scalar_lea.hbm %s1238_s0, 128 }
  0x19   : > { %s735_s10 = scalar_lea.hbm %s1003_s5, 64  ;;  %p741_p12 = scmp.lt.u32.totalorder %s1003_s5, %s1238_s0 }
  0x1a   : > { %p736_p8 = scmp.ne.s32.totalorder %s1003_s5, %s735_s10  ;;  %p742_p13 = scmp.lt.u32.totalorder %s740_s13, %s735_s10 }
  0x1b   : > { %p744_p2 = scmp.lt.u32.totalorder %s735_s10, %s1003_s5 }
  0x1c   : > { %p738_p10 = pnand %p1229_p9, %p736_p8  ;;  %p743_p0 = por %p742_p13, %p741_p12 }
  0x1e   : > { %p739_p11 = pneg %p738_p10  ;;  %p745_p4 = por %p744_p2, %p743_p0 }
  0x20   : > { %p746_p5 = pnand %p745_p4, %p739_p11 }
  0x22   : > { %749 = shalt.err (!%p746_p5)
}
  0x23   : > { %s750_s23 = scalar_lea.vmem %s1009_s8, 64  ;;  %s915_s24 = smov [#allocation3]  }
  0x24   : > { %p751_p6 = scmp.ne.s32.totalorder %s1009_s8, %s750_s23  ;;  %s755_s26 = sshll.u32 %s915_s24, 4  ;;  %s756_s26 = int_to_ptr.vmem [resolvable:$false] %s755_s26 }
  0x25   : > { %s757_s28 = scalar_lea.vmem %s756_s26, 128  ;;  %p758_p3 = scmp.lt.s32.totalorder %s1009_s8, %s756_s26 }
  0x26   : > { %p753_p8 = pnand %p751_p6, %p1229_p9  ;;  %p759_p12 = scmp.lt.s32.totalorder %s757_s28, %s750_s23 }
  0x28   : > { %p754_p10 = pneg %p753_p8  ;;  %p760_p13 = por %p759_p12, %p758_p3 }
  0x2a   : > { %p761_p0 = pnand %p760_p13, %p754_p10 }
  0x2c   : > { %764 = shalt.err (!%p761_p0)
}
  0x2d   : > { %662 = dma.hbm_to_vmem [thread:$0]  (!%p1005_p7), %s1003_s5, 64, %s1009_s8, %s1011_s9  }
  0x2e   : > { %s1040_s29 = sadd.s32 4294967295, %s913_s20   ;;  %s589_s30 = sadd.s32 4294967294, %s913_s20  }
  0x2f   : > { %p62_p3 = scmp.ne.s32.totalorder %s897_s16, %s893_s15  ;;  %p1228_p11 = scmp.eq.s32.totalorder %s1040_s29, 0 }
  0x30   : > { %p170_p2 = scmp.eq.s32.totalorder %s1040_s29, 1  ;;  %p176_p4 = scmp.eq.s32.totalorder %s589_s30, 1 }
  0x31   : > { %p1049_p5 = por %p1228_p11, %p62_p3  ;;  %p590_p6 = scmp.ge.s32.totalorder %s913_s20, 1 }
  0x32   : > { %p1057_p8 = por %p170_p2, %p56_p1  ;;  %p1061_p10 = por %p176_p4, %p62_p3 }
  0x33   : > { %s1240_s7 = scalar_select %p1049_p5, 1, 0 }
  0x34   : > { %s1241_s5 = scalar_select %p1057_p8, 1, 0 }
  0x35   : > { %s1242_s8 = scalar_select %p1061_p10, 1, 0 }
  0x36   : > { %p183_p12 = scmp.lt.s32.totalorder %s913_s20, 3  ;;  %s596_s10 = sshll.u32 %s221_s25, 3 }
  0x37   : > { %s916_s12 = smov [#allocation6]   ;;  %s597_s14 = sshll.u32 %s909_s19, 7 }
  0x38   : > { %p1068_p13 = pnand %p590_p6, %p183_p12  ;;  %s199_s13 = sshll.u32 %s916_s12, 4  ;;  %s1072_s13 = int_to_ptr.vmem [resolvable:$true] %s199_s13 }
  0x39   : > { %s242_s22 = scalar_lea.vmem [#allocation8], %s596_s10  ;;  %s1086_s28 = scalar_lea.hbm %s1224_s3, %s597_s14 }
  0x3a   : > { %s1243_s11 = scalar_select %p1068_p13, 1, 0 }
  0x3b   : > { %p655_p1 = pneg %p1068_p13  ;;  %s250_s23 = sshll.u32 %s242_s22, 4  ;;  %s1088_s23 = int_to_ptr.vmem [resolvable:$true] %s250_s23 }
  0x3c   : > { %s765_s0 = scalar_lea.hbm %s1222_s1, 1024 }
  0x3d   : > { %p1079_p0 = pnand %p655_p1, %p1228_p11  ;;  %p766_p3 = scmp.ne.s32.totalorder %s1222_s1, %s765_s0 }
  0x3e   : > { %p772_p12 = scmp.lt.u32.totalorder %s765_s0, %s1222_s1 }
  0x3f   : > { %p767_p2 = pneg %p1079_p0 }
  0x41   : > { %p768_p4 = pnand %p767_p2, %p766_p3 }
  0x43   : > { %p769_p6 = pneg %p768_p4 }
  0x45   : > { %p774_p1 = pnand %p772_p12, %p769_p6 }
  0x47   : > { %777 = shalt.err (!%p774_p1)
}
  0x48   : > { %s778_s14 = scalar_lea.vmem %s1072_s13, 1024  ;;  %p786_p8 = scmp.lt.s32.totalorder %s1072_s13, %s1072_s13 }
  0x49   : > { %p779_p11 = scmp.ne.s32.totalorder %s1072_s13, %s778_s14  ;;  %p787_p5 = scmp.lt.s32.totalorder %s778_s14, %s778_s14 }
  0x4b   : > { %p781_p9 = pnand %p779_p11, %p767_p2  ;;  %p788_p13 = por %p787_p5, %p786_p8 }
  0x4d   : > { %p782_p10 = pneg %p781_p9 }
  0x4f   : > { %p789_p7 = pnand %p788_p13, %p782_p10 }
  0x51   : > { %792 = shalt.err (!%p789_p7)
}
  0x52   : > { %s917_s21 = smov 64   ;;  %s918_s0 = smov 4  }
  0x53   : > { %658 = dma.hbm_to_vmem [thread:$0]  (!%p1079_p0), %s1222_s1, 1024, %s1072_s13, [#allocation7], %s917_s21, %s917_s21, %s918_s0  }
  0x54   : > { %s793_s26 = scalar_lea.hbm %s1086_s28, 128  ;;  %p1245_p11 = scmp.ne.s32.totalorder %s1239_s6, 0 }
  0x55   : > { %p794_p9 = scmp.ne.s32.totalorder %s1086_s28, %s793_s26  ;;  %s798_s10 = scalar_lea.hbm %s1224_s3, 256 }
  0x56   : > { %p1246_p5 = pneg %p1245_p11  ;;  %p799_p10 = scmp.lt.u32.totalorder %s1086_s28, %s1224_s3 }
  0x57   : > { %p800_p13 = scmp.lt.u32.totalorder %s798_s10, %s793_s26  ;;  %p802_p2 = scmp.lt.u32.totalorder %s793_s26, %s1086_s28 }
  0x58   : > { %p796_p8 = pnand %p794_p9, %p1246_p5 }
  0x59   : > { %p801_p3 = por %p800_p13, %p799_p10 }
  0x5a   : > { %p797_p7 = pneg %p796_p8 }
  0x5b   : > { %p803_p4 = por %p802_p2, %p801_p3 }
  0x5d   : > { %p804_p6 = pnand %p803_p4, %p797_p7 }
  0x5f   : > { %807 = shalt.err (!%p804_p6)
}
  0x60   : > { %s808_s13 = scalar_lea.vmem %s1088_s23, 128  ;;  %p1247_p12 = pmov %p1246_p5 }
  0x61   : > { %p809_p0 = scmp.ne.s32.totalorder %s1088_s23, %s808_s13  ;;  %s919_s24 = smov [#allocation8]  }
  0x62   : > { %s813_s21 = sshll.u32 %s919_s24, 4  ;;  %s814_s21 = int_to_ptr.vmem [resolvable:$false] %s813_s21 }
  0x63   : > { %p811_p1 = pnand %p809_p0, %p1247_p12  ;;  %s815_s0 = scalar_lea.vmem %s814_s21, 256 }
  0x64   : > { %p816_p5 = scmp.lt.s32.totalorder %s1088_s23, %s814_s21  ;;  %p817_p8 = scmp.lt.s32.totalorder %s815_s0, %s808_s13 }
  0x65   : > { %p812_p9 = pneg %p811_p1 }
  0x66   : > { %p818_p10 = por %p817_p8, %p816_p5 }
  0x68   : > { %p819_p13 = pnand %p818_p10, %p812_p9 }
  0x6a   : > { %822 = shalt.err (!%p819_p13)
}
  0x6b   : > { %665 = dma.hbm_to_vmem [thread:$0]  (!%p1245_p11), %s1086_s28, 128, %s1088_s23, %s1011_s9  }
  0x6c   : > { %p1248_p7 = scmp.ne.s32.totalorder %s1243_s11, 0 }
  0x6d   : > { %s261_s19 = sand.u32 (!%p1248_p7), 1, %s1040_s29   ;;  %s1139_s25 = sand.u32 (!%p1248_p7), 1, %s897_s16  }
  0x6e   : > { %259 = sbr.rel (%p1248_p7) target bundleno = 385 (0x181), region = 36  ;;  %s599_s26 = sshll.u32 (!%p1248_p7), %s1139_s25, 2 }
  0x6f   : > { %s262_s30 = scalar_lea.sflag (!%p1248_p7), [#allocation4], %s261_s19  ;;  %s1142_s12 = scalar_lea.vmem (!%p1248_p7), [#allocation3], %s599_s26 }
  0x70   : > { %p1249_p3 = scmp.ne.s32.totalorder (!%p1248_p7), %s1240_s7, 0 }
  0x75   : > { %876 = dma.done.wait (%p1249_p3), %s262_s30, 64  }
  0x76   : > { %878 = vsyncadd (%p1249_p3), %s262_s30, 4294967232  ;;  %p1250_p11 = scmp.eq.s32.totalorder %s1040_s29, 0 }
  0x78   : > { %880 = dma.done.wait (%p1250_p11), [#allocation7], 1024   ;;  %p1251_p2 = pmov %p1250_p11 }
  0x79   : > { %s601_s6 = sshll.u32 %s1139_s25, 3 }
  0x7a   : > { %882 = vsyncadd (%p1251_p2), [#allocation7], 4294966272  ;;  %s1155_s9 = scalar_lea.vmem [#allocation8], %s601_s6 }
  0x7b   : > { %884 = dma.done.wait (%p1249_p3), %s262_s30, 128  }
  0x7c   : > { %886 = vsyncadd (%p1249_p3), %s262_s30, 4294967168  ;;  %v920_v0 = vmov 0.0   ;;  %vm921_vm0 = vmmov 0   ;;  %v727_v1 = vld [vmem:[#allocation6] sm:$0xff]   ;;  %v728_v2 = vld [vmem:[#allocation6 + $0x8] sm:$0xff]   ;;  %s613_s11 = sshll.u32 %s905_s18, 7 }
  0x7d   : > { %625 = vmatprep.subr.bf16.mxu0 %v920_v0  ;;  %641 = vmatprep.mubr.msk.bf16.mxu0 %vm921_vm0, %v920_v0  ;;  %v729_v3 = vld [vmem:[#allocation6 + $0x10] sm:$0xff]   ;;  %v730_v4 = vld [vmem:[#allocation6 + $0x18] sm:$0xff]   ;;  %v731_v5 = vld [vmem:[#allocation6 + $0x20] sm:$0xff]   ;;  %s310_s23 = scalar_lea.vmem [#allocation9], %s601_s6  ;;  %s1172_s14 = scalar_lea.hbm %s1225_s4, %s613_s11 }
  0x7e   : > { %626 = vmatpush3.bf16.msra.mxu0 %v727_v1  ;;  %v732_v6 = vld [vmem:[#allocation6 + $0x28] sm:$0xff]   ;;  %v733_v7 = vld [vmem:[#allocation6 + $0x30] sm:$0xff]   ;;  %v734_v8 = vld [vmem:[#allocation6 + $0x38] sm:$0xff]   ;;  %s458_s28 = sshll.u32 %s310_s23, 4  ;;  %s444_s18 = scalar_lea.sflag [#allocation5], %s1139_s25  ;;  %s1174_s28 = int_to_ptr.vmem [resolvable:$true] %s458_s28 }
  0x7f   : > { %627 = vmatprep.subr.bf16.mxu0 %v920_v0  ;;  %v331_v9 = vld [vmem:[%s1142_s12] sm:$0xf]  ;;  %v320_v10 = vld [vmem:[%s1155_s9] sm:$0xff]  ;;  %s823_s13 = scalar_lea.vmem %s1174_s28, 128  ;;  %p1252_p6 = scmp.ne.s32.totalorder %s1241_s5, 0 }
  0x80   : > { %v603_v11 = vld [vmem:[%s1223_s2] ss:$0 sm:$0xff]  ;;  %p824_p4 = scmp.ne.s32.totalorder %s1174_s28, %s823_s13  ;;  %s922_s24 = smov [#allocation9]  }
  0x81   : > { %v328_v12 = vadd.f32 %v603_v11, %v320_v10  ;;  %s827_s21 = sshll.u32 %s922_s24, 4  ;;  %s828_s21 = int_to_ptr.vmem [resolvable:$false] %s827_s21 }
  0x82   : > { %628 = vmatpush3.bf16.msra.mxu0 %v728_v2  ;;  %p825_p0 = pnand %p824_p4, %p1252_p6  ;;  %s829_s0 = scalar_lea.vmem %s828_s21, 256 }
  0x83   : > { %629 = vmatprep.subr.bf16.mxu0 %v920_v0  ;;  %p830_p1 = scmp.lt.s32.totalorder %s1174_s28, %s828_s21  ;;  %p831_p9 = scmp.lt.s32.totalorder %s829_s0, %s823_s13 }
  0x84   : > { %p826_p12 = pneg %p825_p0 }
  0x85   : > { %p832_p5 = por %p831_p9, %p830_p1 }
  0x86   : > { %630 = vmatpush3.bf16.msra.mxu0 %v729_v3 }
  0x87   : > { %631 = vmatprep.subr.bf16.mxu0 %v920_v0  ;;  %p833_p8 = pnand %p832_p5, %p826_p12 }
  0x8a   : > { %632 = vmatpush3.bf16.msra.mxu0 %v730_v4 }
  0x8b   : > { %633 = vmatprep.subr.bf16.mxu0 %v920_v0 }
  0x8e   : > { %634 = vmatpush3.bf16.msra.mxu0 %v731_v5 }
  0x8f   : > { %635 = vmatprep.subr.bf16.mxu0 %v920_v0 }
  0x92   : > { %636 = vmatpush3.bf16.msra.mxu0 %v732_v6 }
  0x93   : > { %637 = vmatprep.subr.bf16.mxu0 %v920_v0 }
  0x96   : > { %638 = vmatpush3.bf16.msra.mxu0 %v733_v7 }
  0x97   : > { %639 = vmatprep.subr.bf16.mxu0 %v920_v0 }
  0x9a   : > { %640 = vmatpush3.bf16.msra.mxu0 %v734_v8 }
  0x9d   : > { %642 = vmatmul.mubr.bf16.vlgmr.msra.gmra.mrb[0].mxu0 %v331_v9 }
 0x170   : > { %v430_v13 = vpop.f32.mrb[0].mxu0 }
 0x171   : > { %v436_v14 = vadd.f32 %v430_v13, %v328_v12  ;;  %v643_v15 = vpop.f32.mrb[1].mxu0 }
 0x172   : > { %v433_v16 = vpop.f32.mrb[2].mxu0 }
 0x173   : > { %442 = vst [vmem:[%s310_s23] sm:$0xff] %v436_v14  ;;  %v644_v17 = vpop.f32.mrb[3].mxu0 }
 0x174   : > { %836 = shalt.err (!%p833_p8)
}
 0x175   : > { %s837_s19 = scalar_lea.hbm %s1172_s14, 128  ;;  %s841_s30 = scalar_lea.hbm %s1225_s4, 256 }
 0x176   : > { %p838_p10 = scmp.ne.s32.totalorder %s1172_s14, %s837_s19  ;;  %p842_p3 = scmp.lt.u32.totalorder %s1172_s14, %s1225_s4 }
 0x177   : > { %p843_p11 = scmp.lt.u32.totalorder %s841_s30, %s837_s19  ;;  %p845_p4 = scmp.lt.u32.totalorder %s837_s19, %s1172_s14 }
 0x178   : > { %p839_p13 = pnand %p838_p10, %p1252_p6 }
 0x179   : > { %p844_p2 = por %p843_p11, %p842_p3 }
 0x17a   : > { %p840_p7 = pneg %p839_p13 }
 0x17b   : > { %p846_p0 = por %p845_p4, %p844_p2 }
 0x17d   : > { %p847_p12 = pnand %p846_p0, %p840_p7 }
 0x17f   : > { %850 = shalt.err (!%p847_p12)
}
 0x180   : > { %653 = dma.vmem_to_hbm [thread:$0]  (%p1252_p6), %s1174_s28, 128, %s1172_s14, %s444_s18  }
 0x181 PF: > { %s470_s9 = sand.u32 1, %s893_s15   ;;  %p1253_p1 = scmp.ne.s32.totalorder %s1242_s8, 0 }
 0x182   : > { %p1254_p9 = scmp.ge.s32.totalorder %s913_s20, 2  ;;  %s471_s29 = scalar_lea.sflag [#allocation5], %s470_s9 }
 0x184   : > { %p667_p5 = pnand %p1254_p9, %p1253_p1 }
 0x186   : > { %888 = dma.done.wait (!%p667_p5), %s471_s29, 128  }
 0x187   : > { %890 = vsyncadd (!%p667_p5), %s471_s29, 4294967168  ;;  %s21_s20 = sadd.s32 1, %s913_s20   ;;  %s1255_s18 = sld [smem:[#allocation14_spill]] }
 0x188   : > { %p18_p8 = scmp.ge.s32.totalorder %s21_s20, 4   ;;  %s1256_s19 = sld [smem:[#allocation15_spill]] }
 0x189   : > { %s1257_s15 = smov %s897_s16  ;;  %s1258_s16 = smov %s901_s17 }
 0x18a   : > { %s1259_s17 = smov %s996_s27  ;;  %20 = sbr.rel (!%p18_p8) target bundleno = 9 (0x9), region = 108 }
 0x191   :  { %476 = vsyncpa [#allocation4], 1 }
 0x192   :  { %478 = vsyncpa [#allocation4 + $0x1], 1 }
 0x193   :  { %479 = vsyncpa [#allocation7], 1 }
 0x194   :  { %480 = vsyncpa [#allocation5], 1 }
 0x195   :  { %482 = vsyncpa [#allocation5 + $0x1], 1 }

</bundles_post_ra>
